<compile_context>
chip_gen: v6e
topology: v6e:2x2x1
jax: 0.10.0
libtpu: 0.0.40
codegen_flags: <defaults>
</compile_context>

<pallas_src>
import jax
import jax.numpy as jnp
from jax.experimental import pallas as pl
from jax.experimental.pallas import tpu as pltpu


def lstm_fc_kernel(x_ref, wih_ref, whh_ref, b_ref, wfc_ref, bfc_ref,
                   out_ref, xg_sc):
    # x_ref: (T*B, D) time-major, batch padded to a multiple of 8.
    TB, _D = x_ref.shape
    H, H4 = whh_ref.shape
    B = out_ref.shape[0]
    T = TB // B

    # ---- Input projection for ALL timesteps, one MXU matmul (bias folded in).
    xg_sc[...] = (jnp.dot(x_ref[...], wih_ref[...],
                          preferred_element_type=jnp.float32)
                  + b_ref[...])                            # (T*B, 4H)

    # ---- Hoisted loop invariants.
    whh = whh_ref[...]                                     # (H, 4H)
    lane = jax.lax.broadcasted_iota(jnp.int32, (B, H4), 1)
    g_mask = (lane >= 2 * H) & (lane < 3 * H)              # tanh-gate lanes

    def activate(gates):
        # One EUP pass over the full (B, 4H) vreg:
        #   g lanes     -> tanh(x)
        #   i/f/o lanes -> sigmoid(x) = 0.5*tanh(0.5*x) + 0.5
        pre = jnp.where(g_mask, gates, 0.5 * gates)
        th = jnp.tanh(pre)
        return jnp.where(g_mask, th, 0.5 * th + 0.5)

    def cell(act, c):
        i_g = act[:, 0 * H:1 * H]
        f_g = act[:, 1 * H:2 * H]
        g_g = act[:, 2 * H:3 * H]
        o_g = act[:, 3 * H:4 * H]
        c = f_g * c + i_g * g_g
        h = o_g * jnp.tanh(c)
        return h, c

    # ---- Peeled t=0: h0 = c0 = 0, so gates_0 = x-gates only (no h @ W_hh).
    act0 = activate(xg_sc[pl.ds(0, B), :])
    h, c = cell(act0, jnp.zeros((B, H), jnp.float32))

    # ---- Serial recurrence for t = 1..T-1; h/c stay in vregs as loop carries.
    def step(t, carry):
        h, c = carry
        row = pl.multiple_of(t * B, 8)                     # aligned sublane start
        gates = (xg_sc[pl.ds(row, B), :]
                 + jnp.dot(h, whh, preferred_element_type=jnp.float32))  # (B, 4H)
        return cell(activate(gates), c)

    unroll = True if T <= 16 else 8                        # cap unroll for long T
    h, _ = jax.lax.fori_loop(1, T, step, (h, c), unroll=unroll)

    # ---- fc head: Linear(H, 1) as a VPU reduction (no degenerate N=1 MXU pass).
    out_ref[...] = (jnp.sum(h * wfc_ref[...], axis=-1, keepdims=True)
                    + bfc_ref[...])                        # (B, 1)


def prepare_params(w_ih, w_hh, b_ih, b_hh, w_fc, b_fc):
    """One-time parameter layout prep (PyTorch shapes in, kernel layout out).
    w_ih (4H, D), w_hh (4H, H), b_ih (4H,), b_hh (4H,), w_fc (1, H), b_fc (1,)."""
    H4 = w_ih.shape[0]
    H = H4 // 4
    wih_t = jnp.asarray(w_ih, jnp.float32).T                # (D, 4H)
    whh_t = jnp.asarray(w_hh, jnp.float32).T                # (H, 4H)
    b = (jnp.asarray(b_ih, jnp.float32)
         + jnp.asarray(b_hh, jnp.float32)).reshape(1, H4)   # (1, 4H) combined bias
    wfc_row = jnp.asarray(w_fc, jnp.float32).reshape(1, H)  # (1, H)
    bfc = jnp.asarray(b_fc, jnp.float32).reshape(1, 1)      # (1, 1)
    return wih_t, whh_t, b, wfc_row, bfc


def lstm_model_forward(x, params):
    """x: (B, T, D) float32 (batch_first). params = prepare_params(...)."""
    wih_t, whh_t, b, wfc_row, bfc = params
    B, T, D = x.shape
    H, H4 = whh_t.shape
    B_pad = ((B + 7) // 8) * 8                             # f32 sublane minimum

    # Per-call layout glue on activations only (weights already prepped once).
    x_tm = jnp.swapaxes(jnp.asarray(x, jnp.float32), 0, 1)  # (T, B, D) time-major
    if B_pad != B:
        x_tm = jnp.pad(x_tm, ((0, 0), (0, B_pad - B), (0, 0)))
    x_2d = x_tm.reshape(T * B_pad, D)                       # (T*B_pad, D)

    grid_spec = pltpu.PrefetchScalarGridSpec(
        num_scalar_prefetch=0,
        grid=(1,),                                          # single invocation
        in_specs=[
            pl.BlockSpec((T * B_pad, D), lambda i: (0, 0)),   # all timesteps
            pl.BlockSpec((D, H4), lambda i: (0, 0)),          # W_ih^T
            pl.BlockSpec((H, H4), lambda i: (0, 0)),          # W_hh^T
            pl.BlockSpec((1, H4), lambda i: (0, 0)),          # combined bias
            pl.BlockSpec((1, H), lambda i: (0, 0)),           # W_fc row
            pl.BlockSpec((1, 1), lambda i: (0, 0)),           # b_fc
        ],
        out_specs=pl.BlockSpec((B_pad, 1), lambda i: (0, 0)),
        scratch_shapes=[
            pltpu.VMEM((T * B_pad, H4), jnp.float32),         # precomputed x-gates
        ],
    )

    out = pl.pallas_call(
        lstm_fc_kernel,
        out_shape=jax.ShapeDtypeStruct((B_pad, 1), jnp.float32),
        grid_spec=grid_spec,
        compiler_params=pltpu.CompilerParams(
            dimension_semantics=("arbitrary",)),
    )(x_2d, wih_t, whh_t, b, wfc_row, bfc)
    return out[:B]


def lstm_model_reference(x, w_ih, w_hh, b_ih, b_hh, w_fc, b_fc):
    """Pure-JAX reference matching torch.nn.LSTM + Linear semantics."""
    B, T, D = x.shape
    H = w_hh.shape[1]
    h = jnp.zeros((B, H), jnp.float32)
    c = jnp.zeros((B, H), jnp.float32)

    def step(carry, x_t):
        h, c = carry
        gates = x_t @ w_ih.T + b_ih + h @ w_hh.T + b_hh
        i = jax.nn.sigmoid(gates[:, 0 * H:1 * H])
        f = jax.nn.sigmoid(gates[:, 1 * H:2 * H])
        g = jnp.tanh(gates[:, 2 * H:3 * H])
        o = jax.nn.sigmoid(gates[:, 3 * H:4 * H])
        c = f * c + i * g
        h = o * jnp.tanh(c)
        return (h, c), None

    (h, c), _ = jax.lax.scan(step, (h, c), jnp.swapaxes(x, 0, 1))
    return h @ w_fc.T + b_fc


if __name__ == "__main__":
    # Small shapes consistent with the module: batch=4, seq=8, input=8, hidden=32.
    B, T, D, H = 4, 8, 8, 32
    key = jax.random.PRNGKey(0)
    ks = jax.random.split(key, 7)
    bound = 1.0 / jnp.sqrt(H)

    x = jax.random.normal(ks[0], (B, T, D), dtype=jnp.float32)
    w_ih = jax.random.uniform(ks[1], (4 * H, D), minval=-bound, maxval=bound, dtype=jnp.float32)
    w_hh = jax.random.uniform(ks[2], (4 * H, H), minval=-bound, maxval=bound, dtype=jnp.float32)
    b_ih = jax.random.uniform(ks[3], (4 * H,), minval=-bound, maxval=bound, dtype=jnp.float32)
    b_hh = jax.random.uniform(ks[4], (4 * H,), minval=-bound, maxval=bound, dtype=jnp.float32)
    w_fc = jax.random.uniform(ks[5], (1, H), minval=-bound, maxval=bound, dtype=jnp.float32)
    b_fc = jax.random.uniform(ks[6], (1,), minval=-bound, maxval=bound, dtype=jnp.float32)

    params = prepare_params(w_ih, w_hh, b_ih, b_hh, w_fc, b_fc)  # one-time prep
    out = lstm_model_forward(x, params)
    out = jax.block_until_ready(out)

    ref = lstm_model_reference(x, w_ih, w_hh, b_ih, b_hh, w_fc, b_fc)
    assert out.shape == (B, 1), out.shape
    # Tolerance slightly loosened: kernel computes sigmoid via the exact
    # tanh identity, which differs from jax.nn.sigmoid only at ulp level.
    assert jnp.allclose(out, ref, atol=1e-4, rtol=1e-4), (out, ref)

    print("KERNEL_OK")
</pallas_src>

<mosaic_0001>
module attributes {stable_mosaic.version = 11 : i64} {
  func.func @lstm_fc_kernel(%arg0: i32, %arg1: memref<64x8xf32, #tpu.memory_space<vmem>>, %arg2: memref<8x128xf32, #tpu.memory_space<vmem>>, %arg3: memref<32x128xf32, #tpu.memory_space<vmem>>, %arg4: memref<1x128xf32, #tpu.memory_space<vmem>>, %arg5: memref<1x32xf32, #tpu.memory_space<vmem>>, %arg6: memref<1x1xf32, #tpu.memory_space<vmem>>, %arg7: memref<8x1xf32, #tpu.memory_space<vmem>>, %arg8: memref<64x128xf32, #tpu.memory_space<vmem>>) attributes {dimension_semantics = [#tpu.dimension_semantics<arbitrary>], iteration_bounds = array<i64: 1>, scalar_prefetch = 0 : i64, scratch_operands = 1 : i64, tpu.core_type = #tpu.core_type<tc>, window_params = [{pipeline_mode = #tpu.pipeline_mode<synchronous>, transform_indices = @transform_0, window_bounds = array<i64: 64, 8>}, {pipeline_mode = #tpu.pipeline_mode<synchronous>, transform_indices = @transform_1, window_bounds = array<i64: 8, 128>}, {pipeline_mode = #tpu.pipeline_mode<synchronous>, transform_indices = @transform_2, window_bounds = array<i64: 32, 128>}, {pipeline_mode = #tpu.pipeline_mode<synchronous>, transform_indices = @transform_3, window_bounds = array<i64: 1, 128>}, {pipeline_mode = #tpu.pipeline_mode<synchronous>, transform_indices = @transform_4, window_bounds = array<i64: 1, 32>}, {pipeline_mode = #tpu.pipeline_mode<synchronous>, transform_indices = @transform_5, window_bounds = array<i64: 1, 1>}, {pipeline_mode = #tpu.pipeline_mode<synchronous>, transform_indices = @transform_6, window_bounds = array<i64: 8, 1>}]} {
    %c0 = arith.constant 0 : index
    %c0_0 = arith.constant 0 : index
    %0 = vector.load %arg1[%c0, %c0_0] : memref<64x8xf32, #tpu.memory_space<vmem>>, vector<64x8xf32>
    %c0_1 = arith.constant 0 : index
    %c0_2 = arith.constant 0 : index
    %1 = vector.load %arg2[%c0_1, %c0_2] : memref<8x128xf32, #tpu.memory_space<vmem>>, vector<8x128xf32>
    %cst = arith.constant dense<0.000000e+00> : vector<64x128xf32>
    %2 = tpu.matmul %0, %1, %cst {dimension_numbers = #tpu.dot_dimension_numbers<[1], [0], [0], [1], [0, 0, 1, 1], [], []>} : vector<64x8xf32>, vector<8x128xf32>, vector<64x128xf32> -> vector<64x128xf32>
    %c0_3 = arith.constant 0 : index
    %c0_4 = arith.constant 0 : index
    %3 = vector.load %arg4[%c0_3, %c0_4] : memref<1x128xf32, #tpu.memory_space<vmem>>, vector<1x128xf32>
    %4 = vector.broadcast %3 : vector<1x128xf32> to vector<64x128xf32>
    %5 = arith.addf %2, %4 : vector<64x128xf32>
    %c0_5 = arith.constant 0 : index
    %c0_6 = arith.constant 0 : index
    %6 = vector.load %arg8[%c0_5, %c0_6] : memref<64x128xf32, #tpu.memory_space<vmem>>, vector<64x128xf32>
    tpu.vector_store %arg8[%c0_5, %c0_6], %5 {strides = array<i32>} : memref<64x128xf32, #tpu.memory_space<vmem>>, vector<64x128xf32>,
    %c0_7 = arith.constant 0 : index
    %c0_8 = arith.constant 0 : index
    %7 = vector.load %arg3[%c0_7, %c0_8] : memref<32x128xf32, #tpu.memory_space<vmem>>, vector<32x128xf32>
    %8 = tpu.iota {dimensions = array<i32: 1>} : vector<8x128xi32>
    %c64_i32 = arith.constant 64 : i32
    %9 = vector.broadcast %c64_i32 : i32 to vector<8x128xi32>
    %10 = arith.cmpi sge, %8, %9 : vector<8x128xi32>
    %c96_i32 = arith.constant 96 : i32
    %11 = vector.broadcast %c96_i32 : i32 to vector<8x128xi32>
    %12 = arith.cmpi slt, %8, %11 : vector<8x128xi32>
    %13 = arith.andi %10, %12 : vector<8x128xi1>
    %c0_9 = arith.constant 0 : index
    %c0_10 = arith.constant 0 : index
    %14 = vector.load %arg8[%c0_9, %c0_10] : memref<64x128xf32, #tpu.memory_space<vmem>>, vector<8x128xf32>
    %cst_11 = arith.constant 5.000000e-01 : f32
    %15 = vector.broadcast %cst_11 : f32 to vector<8x128xf32>
    %16 = arith.mulf %15, %14 : vector<8x128xf32>
    %17 = arith.select %13, %14, %16 : vector<8x128xi1>, vector<8x128xf32>
    %18 = math.tanh %17 : vector<8x128xf32>
    %cst_12 = arith.constant 5.000000e-01 : f32
    %19 = vector.broadcast %cst_12 : f32 to vector<8x128xf32>
    %20 = arith.mulf %19, %18 : vector<8x128xf32>
    %cst_13 = arith.constant 5.000000e-01 : f32
    %21 = vector.broadcast %cst_13 : f32 to vector<8x128xf32>
    %22 = arith.addf %20, %21 : vector<8x128xf32>
    %23 = arith.select %13, %18, %22 : vector<8x128xi1>, vector<8x128xf32>
    %cst_14 = arith.constant 0.000000e+00 : f32
    %24 = vector.broadcast %cst_14 : f32 to vector<8x32xf32>
    %25 = vector.extract_strided_slice %23 {offsets = [0, 0], sizes = [8, 32], strides = [1, 1]} : vector<8x128xf32> to vector<8x32xf32>
    %26 = vector.extract_strided_slice %23 {offsets = [0, 32], sizes = [8, 32], strides = [1, 1]} : vector<8x128xf32> to vector<8x32xf32>
    %27 = vector.extract_strided_slice %23 {offsets = [0, 64], sizes = [8, 32], strides = [1, 1]} : vector<8x128xf32> to vector<8x32xf32>
    %28 = vector.extract_strided_slice %23 {offsets = [0, 96], sizes = [8, 32], strides = [1, 1]} : vector<8x128xf32> to vector<8x32xf32>
    %29 = arith.mulf %26, %24 : vector<8x32xf32>
    %30 = arith.mulf %25, %27 : vector<8x32xf32>
    %31 = arith.addf %29, %30 : vector<8x32xf32>
    %32 = math.tanh %31 : vector<8x32xf32>
    %33 = arith.mulf %28, %32 : vector<8x32xf32>
    %c1_i32 = arith.constant 1 : i32
    %c8_i32 = arith.constant 8 : i32
    %34 = arith.muli %c1_i32, %c8_i32 : i32
    %35 = tpu.assume_multiple %34, 8 : i32
    %36 = arith.index_cast %35 : i32 to index
    %c0_15 = arith.constant 0 : index
    %37 = vector.load %arg8[%36, %c0_15] : memref<64x128xf32, #tpu.memory_space<vmem>>, vector<8x128xf32>
    %cst_16 = arith.constant dense<0.000000e+00> : vector<8x128xf32>
    %38 = tpu.matmul %33, %7, %cst_16 {dimension_numbers = #tpu.dot_dimension_numbers<[1], [0], [0], [1], [0, 0, 1, 1], [], []>} : vector<8x32xf32>, vector<32x128xf32>, vector<8x128xf32> -> vector<8x128xf32>
    %39 = arith.addf %37, %38 : vector<8x128xf32>
    %cst_17 = arith.constant 5.000000e-01 : f32
    %40 = vector.broadcast %cst_17 : f32 to vector<8x128xf32>
    %41 = arith.mulf %40, %39 : vector<8x128xf32>
    %42 = arith.select %13, %39, %41 : vector<8x128xi1>, vector<8x128xf32>
    %43 = math.tanh %42 : vector<8x128xf32>
    %cst_18 = arith.constant 5.000000e-01 : f32
    %44 = vector.broadcast %cst_18 : f32 to vector<8x128xf32>
    %45 = arith.mulf %44, %43 : vector<8x128xf32>
    %cst_19 = arith.constant 5.000000e-01 : f32
    %46 = vector.broadcast %cst_19 : f32 to vector<8x128xf32>
    %47 = arith.addf %45, %46 : vector<8x128xf32>
    %48 = arith.select %13, %43, %47 : vector<8x128xi1>, vector<8x128xf32>
    %49 = vector.extract_strided_slice %48 {offsets = [0, 0], sizes = [8, 32], strides = [1, 1]} : vector<8x128xf32> to vector<8x32xf32>
    %50 = vector.extract_strided_slice %48 {offsets = [0, 32], sizes = [8, 32], strides = [1, 1]} : vector<8x128xf32> to vector<8x32xf32>
    %51 = vector.extract_strided_slice %48 {offsets = [0, 64], sizes = [8, 32], strides = [1, 1]} : vector<8x128xf32> to vector<8x32xf32>
    %52 = vector.extract_strided_slice %48 {offsets = [0, 96], sizes = [8, 32], strides = [1, 1]} : vector<8x128xf32> to vector<8x32xf32>
    %53 = arith.mulf %50, %31 : vector<8x32xf32>
    %54 = arith.mulf %49, %51 : vector<8x32xf32>
    %55 = arith.addf %53, %54 : vector<8x32xf32>
    %56 = math.tanh %55 : vector<8x32xf32>
    %57 = arith.mulf %52, %56 : vector<8x32xf32>
    %c2_i32 = arith.constant 2 : i32
    %c8_i32_20 = arith.constant 8 : i32
    %58 = arith.muli %c2_i32, %c8_i32_20 : i32
    %59 = tpu.assume_multiple %58, 8 : i32
    %60 = arith.index_cast %59 : i32 to index
    %c0_21 = arith.constant 0 : index
    %61 = vector.load %arg8[%60, %c0_21] : memref<64x128xf32, #tpu.memory_space<vmem>>, vector<8x128xf32>
    %cst_22 = arith.constant dense<0.000000e+00> : vector<8x128xf32>
    %62 = tpu.matmul %57, %7, %cst_22 {dimension_numbers = #tpu.dot_dimension_numbers<[1], [0], [0], [1], [0, 0, 1, 1], [], []>} : vector<8x32xf32>, vector<32x128xf32>, vector<8x128xf32> -> vector<8x128xf32>
    %63 = arith.addf %61, %62 : vector<8x128xf32>
    %cst_23 = arith.constant 5.000000e-01 : f32
    %64 = vector.broadcast %cst_23 : f32 to vector<8x128xf32>
    %65 = arith.mulf %64, %63 : vector<8x128xf32>
    %66 = arith.select %13, %63, %65 : vector<8x128xi1>, vector<8x128xf32>
    %67 = math.tanh %66 : vector<8x128xf32>
    %cst_24 = arith.constant 5.000000e-01 : f32
    %68 = vector.broadcast %cst_24 : f32 to vector<8x128xf32>
    %69 = arith.mulf %68, %67 : vector<8x128xf32>
    %cst_25 = arith.constant 5.000000e-01 : f32
    %70 = vector.broadcast %cst_25 : f32 to vector<8x128xf32>
    %71 = arith.addf %69, %70 : vector<8x128xf32>
    %72 = arith.select %13, %67, %71 : vector<8x128xi1>, vector<8x128xf32>
    %73 = vector.extract_strided_slice %72 {offsets = [0, 0], sizes = [8, 32], strides = [1, 1]} : vector<8x128xf32> to vector<8x32xf32>
    %74 = vector.extract_strided_slice %72 {offsets = [0, 32], sizes = [8, 32], strides = [1, 1]} : vector<8x128xf32> to vector<8x32xf32>
    %75 = vector.extract_strided_slice %72 {offsets = [0, 64], sizes = [8, 32], strides = [1, 1]} : vector<8x128xf32> to vector<8x32xf32>
    %76 = vector.extract_strided_slice %72 {offsets = [0, 96], sizes = [8, 32], strides = [1, 1]} : vector<8x128xf32> to vector<8x32xf32>
    %77 = arith.mulf %74, %55 : vector<8x32xf32>
    %78 = arith.mulf %73, %75 : vector<8x32xf32>
    %79 = arith.addf %77, %78 : vector<8x32xf32>
    %80 = math.tanh %79 : vector<8x32xf32>
    %81 = arith.mulf %76, %80 : vector<8x32xf32>
    %c3_i32 = arith.constant 3 : i32
    %c8_i32_26 = arith.constant 8 : i32
    %82 = arith.muli %c3_i32, %c8_i32_26 : i32
    %83 = tpu.assume_multiple %82, 8 : i32
    %84 = arith.index_cast %83 : i32 to index
    %c0_27 = arith.constant 0 : index
    %85 = vector.load %arg8[%84, %c0_27] : memref<64x128xf32, #tpu.memory_space<vmem>>, vector<8x128xf32>
    %cst_28 = arith.constant dense<0.000000e+00> : vector<8x128xf32>
    %86 = tpu.matmul %81, %7, %cst_28 {dimension_numbers = #tpu.dot_dimension_numbers<[1], [0], [0], [1], [0, 0, 1, 1], [], []>} : vector<8x32xf32>, vector<32x128xf32>, vector<8x128xf32> -> vector<8x128xf32>
    %87 = arith.addf %85, %86 : vector<8x128xf32>
    %cst_29 = arith.constant 5.000000e-01 : f32
    %88 = vector.broadcast %cst_29 : f32 to vector<8x128xf32>
    %89 = arith.mulf %88, %87 : vector<8x128xf32>
    %90 = arith.select %13, %87, %89 : vector<8x128xi1>, vector<8x128xf32>
    %91 = math.tanh %90 : vector<8x128xf32>
    %cst_30 = arith.constant 5.000000e-01 : f32
    %92 = vector.broadcast %cst_30 : f32 to vector<8x128xf32>
    %93 = arith.mulf %92, %91 : vector<8x128xf32>
    %cst_31 = arith.constant 5.000000e-01 : f32
    %94 = vector.broadcast %cst_31 : f32 to vector<8x128xf32>
    %95 = arith.addf %93, %94 : vector<8x128xf32>
    %96 = arith.select %13, %91, %95 : vector<8x128xi1>, vector<8x128xf32>
    %97 = vector.extract_strided_slice %96 {offsets = [0, 0], sizes = [8, 32], strides = [1, 1]} : vector<8x128xf32> to vector<8x32xf32>
    %98 = vector.extract_strided_slice %96 {offsets = [0, 32], sizes = [8, 32], strides = [1, 1]} : vector<8x128xf32> to vector<8x32xf32>
    %99 = vector.extract_strided_slice %96 {offsets = [0, 64], sizes = [8, 32], strides = [1, 1]} : vector<8x128xf32> to vector<8x32xf32>
    %100 = vector.extract_strided_slice %96 {offsets = [0, 96], sizes = [8, 32], strides = [1, 1]} : vector<8x128xf32> to vector<8x32xf32>
    %101 = arith.mulf %98, %79 : vector<8x32xf32>
    %102 = arith.mulf %97, %99 : vector<8x32xf32>
    %103 = arith.addf %101, %102 : vector<8x32xf32>
    %104 = math.tanh %103 : vector<8x32xf32>
    %105 = arith.mulf %100, %104 : vector<8x32xf32>
    %c4_i32 = arith.constant 4 : i32
    %c8_i32_32 = arith.constant 8 : i32
    %106 = arith.muli %c4_i32, %c8_i32_32 : i32
    %107 = tpu.assume_multiple %106, 8 : i32
    %108 = arith.index_cast %107 : i32 to index
    %c0_33 = arith.constant 0 : index
    %109 = vector.load %arg8[%108, %c0_33] : memref<64x128xf32, #tpu.memory_space<vmem>>, vector<8x128xf32>
    %cst_34 = arith.constant dense<0.000000e+00> : vector<8x128xf32>
    %110 = tpu.matmul %105, %7, %cst_34 {dimension_numbers = #tpu.dot_dimension_numbers<[1], [0], [0], [1], [0, 0, 1, 1], [], []>} : vector<8x32xf32>, vector<32x128xf32>, vector<8x128xf32> -> vector<8x128xf32>
    %111 = arith.addf %109, %110 : vector<8x128xf32>
    %cst_35 = arith.constant 5.000000e-01 : f32
    %112 = vector.broadcast %cst_35 : f32 to vector<8x128xf32>
    %113 = arith.mulf %112, %111 : vector<8x128xf32>
    %114 = arith.select %13, %111, %113 : vector<8x128xi1>, vector<8x128xf32>
    %115 = math.tanh %114 : vector<8x128xf32>
    %cst_36 = arith.constant 5.000000e-01 : f32
    %116 = vector.broadcast %cst_36 : f32 to vector<8x128xf32>
    %117 = arith.mulf %116, %115 : vector<8x128xf32>
    %cst_37 = arith.constant 5.000000e-01 : f32
    %118 = vector.broadcast %cst_37 : f32 to vector<8x128xf32>
    %119 = arith.addf %117, %118 : vector<8x128xf32>
    %120 = arith.select %13, %115, %119 : vector<8x128xi1>, vector<8x128xf32>
    %121 = vector.extract_strided_slice %120 {offsets = [0, 0], sizes = [8, 32], strides = [1, 1]} : vector<8x128xf32> to vector<8x32xf32>
    %122 = vector.extract_strided_slice %120 {offsets = [0, 32], sizes = [8, 32], strides = [1, 1]} : vector<8x128xf32> to vector<8x32xf32>
    %123 = vector.extract_strided_slice %120 {offsets = [0, 64], sizes = [8, 32], strides = [1, 1]} : vector<8x128xf32> to vector<8x32xf32>
    %124 = vector.extract_strided_slice %120 {offsets = [0, 96], sizes = [8, 32], strides = [1, 1]} : vector<8x128xf32> to vector<8x32xf32>
    %125 = arith.mulf %122, %103 : vector<8x32xf32>
    %126 = arith.mulf %121, %123 : vector<8x32xf32>
    %127 = arith.addf %125, %126 : vector<8x32xf32>
    %128 = math.tanh %127 : vector<8x32xf32>
    %129 = arith.mulf %124, %128 : vector<8x32xf32>
    %c5_i32 = arith.constant 5 : i32
    %c8_i32_38 = arith.constant 8 : i32
    %130 = arith.muli %c5_i32, %c8_i32_38 : i32
    %131 = tpu.assume_multiple %130, 8 : i32
    %132 = arith.index_cast %131 : i32 to index
    %c0_39 = arith.constant 0 : index
    %133 = vector.load %arg8[%132, %c0_39] : memref<64x128xf32, #tpu.memory_space<vmem>>, vector<8x128xf32>
    %cst_40 = arith.constant dense<0.000000e+00> : vector<8x128xf32>
    %134 = tpu.matmul %129, %7, %cst_40 {dimension_numbers = #tpu.dot_dimension_numbers<[1], [0], [0], [1], [0, 0, 1, 1], [], []>} : vector<8x32xf32>, vector<32x128xf32>, vector<8x128xf32> -> vector<8x128xf32>
    %135 = arith.addf %133, %134 : vector<8x128xf32>
    %cst_41 = arith.constant 5.000000e-01 : f32
    %136 = vector.broadcast %cst_41 : f32 to vector<8x128xf32>
    %137 = arith.mulf %136, %135 : vector<8x128xf32>
    %138 = arith.select %13, %135, %137 : vector<8x128xi1>, vector<8x128xf32>
    %139 = math.tanh %138 : vector<8x128xf32>
    %cst_42 = arith.constant 5.000000e-01 : f32
    %140 = vector.broadcast %cst_42 : f32 to vector<8x128xf32>
    %141 = arith.mulf %140, %139 : vector<8x128xf32>
    %cst_43 = arith.constant 5.000000e-01 : f32
    %142 = vector.broadcast %cst_43 : f32 to vector<8x128xf32>
    %143 = arith.addf %141, %142 : vector<8x128xf32>
    %144 = arith.select %13, %139, %143 : vector<8x128xi1>, vector<8x128xf32>
    %145 = vector.extract_strided_slice %144 {offsets = [0, 0], sizes = [8, 32], strides = [1, 1]} : vector<8x128xf32> to vector<8x32xf32>
    %146 = vector.extract_strided_slice %144 {offsets = [0, 32], sizes = [8, 32], strides = [1, 1]} : vector<8x128xf32> to vector<8x32xf32>
    %147 = vector.extract_strided_slice %144 {offsets = [0, 64], sizes = [8, 32], strides = [1, 1]} : vector<8x128xf32> to vector<8x32xf32>
    %148 = vector.extract_strided_slice %144 {offsets = [0, 96], sizes = [8, 32], strides = [1, 1]} : vector<8x128xf32> to vector<8x32xf32>
    %149 = arith.mulf %146, %127 : vector<8x32xf32>
    %150 = arith.mulf %145, %147 : vector<8x32xf32>
    %151 = arith.addf %149, %150 : vector<8x32xf32>
    %152 = math.tanh %151 : vector<8x32xf32>
    %153 = arith.mulf %148, %152 : vector<8x32xf32>
    %c6_i32 = arith.constant 6 : i32
    %c8_i32_44 = arith.constant 8 : i32
    %154 = arith.muli %c6_i32, %c8_i32_44 : i32
    %155 = tpu.assume_multiple %154, 8 : i32
    %156 = arith.index_cast %155 : i32 to index
    %c0_45 = arith.constant 0 : index
    %157 = vector.load %arg8[%156, %c0_45] : memref<64x128xf32, #tpu.memory_space<vmem>>, vector<8x128xf32>
    %cst_46 = arith.constant dense<0.000000e+00> : vector<8x128xf32>
    %158 = tpu.matmul %153, %7, %cst_46 {dimension_numbers = #tpu.dot_dimension_numbers<[1], [0], [0], [1], [0, 0, 1, 1], [], []>} : vector<8x32xf32>, vector<32x128xf32>, vector<8x128xf32> -> vector<8x128xf32>
    %159 = arith.addf %157, %158 : vector<8x128xf32>
    %cst_47 = arith.constant 5.000000e-01 : f32
    %160 = vector.broadcast %cst_47 : f32 to vector<8x128xf32>
    %161 = arith.mulf %160, %159 : vector<8x128xf32>
    %162 = arith.select %13, %159, %161 : vector<8x128xi1>, vector<8x128xf32>
    %163 = math.tanh %162 : vector<8x128xf32>
    %cst_48 = arith.constant 5.000000e-01 : f32
    %164 = vector.broadcast %cst_48 : f32 to vector<8x128xf32>
    %165 = arith.mulf %164, %163 : vector<8x128xf32>
    %cst_49 = arith.constant 5.000000e-01 : f32
    %166 = vector.broadcast %cst_49 : f32 to vector<8x128xf32>
    %167 = arith.addf %165, %166 : vector<8x128xf32>
    %168 = arith.select %13, %163, %167 : vector<8x128xi1>, vector<8x128xf32>
    %169 = vector.extract_strided_slice %168 {offsets = [0, 0], sizes = [8, 32], strides = [1, 1]} : vector<8x128xf32> to vector<8x32xf32>
    %170 = vector.extract_strided_slice %168 {offsets = [0, 32], sizes = [8, 32], strides = [1, 1]} : vector<8x128xf32> to vector<8x32xf32>
    %171 = vector.extract_strided_slice %168 {offsets = [0, 64], sizes = [8, 32], strides = [1, 1]} : vector<8x128xf32> to vector<8x32xf32>
    %172 = vector.extract_strided_slice %168 {offsets = [0, 96], sizes = [8, 32], strides = [1, 1]} : vector<8x128xf32> to vector<8x32xf32>
    %173 = arith.mulf %170, %151 : vector<8x32xf32>
    %174 = arith.mulf %169, %171 : vector<8x32xf32>
    %175 = arith.addf %173, %174 : vector<8x32xf32>
    %176 = math.tanh %175 : vector<8x32xf32>
    %177 = arith.mulf %172, %176 : vector<8x32xf32>
    %c7_i32 = arith.constant 7 : i32
    %c8_i32_50 = arith.constant 8 : i32
    %178 = arith.muli %c7_i32, %c8_i32_50 : i32
    %179 = tpu.assume_multiple %178, 8 : i32
    %180 = arith.index_cast %179 : i32 to index
    %c0_51 = arith.constant 0 : index
    %181 = vector.load %arg8[%180, %c0_51] : memref<64x128xf32, #tpu.memory_space<vmem>>, vector<8x128xf32>
    %cst_52 = arith.constant dense<0.000000e+00> : vector<8x128xf32>
    %182 = tpu.matmul %177, %7, %cst_52 {dimension_numbers = #tpu.dot_dimension_numbers<[1], [0], [0], [1], [0, 0, 1, 1], [], []>} : vector<8x32xf32>, vector<32x128xf32>, vector<8x128xf32> -> vector<8x128xf32>
    %183 = arith.addf %181, %182 : vector<8x128xf32>
    %cst_53 = arith.constant 5.000000e-01 : f32
    %184 = vector.broadcast %cst_53 : f32 to vector<8x128xf32>
    %185 = arith.mulf %184, %183 : vector<8x128xf32>
    %186 = arith.select %13, %183, %185 : vector<8x128xi1>, vector<8x128xf32>
    %187 = math.tanh %186 : vector<8x128xf32>
    %cst_54 = arith.constant 5.000000e-01 : f32
    %188 = vector.broadcast %cst_54 : f32 to vector<8x128xf32>
    %189 = arith.mulf %188, %187 : vector<8x128xf32>
    %cst_55 = arith.constant 5.000000e-01 : f32
    %190 = vector.broadcast %cst_55 : f32 to vector<8x128xf32>
    %191 = arith.addf %189, %190 : vector<8x128xf32>
    %192 = arith.select %13, %187, %191 : vector<8x128xi1>, vector<8x128xf32>
    %193 = vector.extract_strided_slice %192 {offsets = [0, 0], sizes = [8, 32], strides = [1, 1]} : vector<8x128xf32> to vector<8x32xf32>
    %194 = vector.extract_strided_slice %192 {offsets = [0, 32], sizes = [8, 32], strides = [1, 1]} : vector<8x128xf32> to vector<8x32xf32>
    %195 = vector.extract_strided_slice %192 {offsets = [0, 64], sizes = [8, 32], strides = [1, 1]} : vector<8x128xf32> to vector<8x32xf32>
    %196 = vector.extract_strided_slice %192 {offsets = [0, 96], sizes = [8, 32], strides = [1, 1]} : vector<8x128xf32> to vector<8x32xf32>
    %197 = arith.mulf %194, %175 : vector<8x32xf32>
    %198 = arith.mulf %193, %195 : vector<8x32xf32>
    %199 = arith.addf %197, %198 : vector<8x32xf32>
    %200 = math.tanh %199 : vector<8x32xf32>
    %201 = arith.mulf %196, %200 : vector<8x32xf32>
    %c7_i32_56 = arith.constant 7 : i32
    %c0_57 = arith.constant 0 : index
    %c0_58 = arith.constant 0 : index
    %202 = vector.load %arg5[%c0_57, %c0_58] : memref<1x32xf32, #tpu.memory_space<vmem>>, vector<1x32xf32>
    %203 = vector.broadcast %202 : vector<1x32xf32> to vector<8x32xf32>
    %204 = arith.mulf %201, %203 : vector<8x32xf32>
    %cst_59 = arith.constant dense<0.000000e+00> : vector<8xf32>
    %205 = vector.multi_reduction <add>, %204, %cst_59 [1] : vector<8x32xf32> to vector<8xf32>
    %206 = vector.shape_cast %205 : vector<8xf32> to vector<8x1xf32>
    %c0_60 = arith.constant 0 : index
    %c0_61 = arith.constant 0 : index
    %207 = vector.load %arg6[%c0_60, %c0_61] : memref<1x1xf32, #tpu.memory_space<vmem>>, vector<1x1xf32>
    %208 = vector.broadcast %207 : vector<1x1xf32> to vector<8x1xf32>
    %209 = arith.addf %206, %208 : vector<8x1xf32>
    %c0_62 = arith.constant 0 : index
    %c0_63 = arith.constant 0 : index
    %210 = vector.load %arg7[%c0_62, %c0_63] : memref<8x1xf32, #tpu.memory_space<vmem>>, vector<8x1xf32>
    tpu.vector_store %arg7[%c0_62, %c0_63], %209 {strides = array<i32>} : memref<8x1xf32, #tpu.memory_space<vmem>>, vector<8x1xf32>,
    return
  }
  func.func @transform_0(%arg0: i32) -> (i32, i32) {
    %c0_i32 = arith.constant 0 : i32
    %c0_i32_0 = arith.constant 0 : i32
    %c0_i32_1 = arith.constant 0 : i32
    return %c0_i32, %c0_i32_0 : i32, i32
  }
  func.func @transform_1(%arg0: i32) -> (i32, i32) {
    %c0_i32 = arith.constant 0 : i32
    %c0_i32_0 = arith.constant 0 : i32
    %c0_i32_1 = arith.constant 0 : i32
    return %c0_i32, %c0_i32_0 : i32, i32
  }
  func.func @transform_2(%arg0: i32) -> (i32, i32) {
    %c0_i32 = arith.constant 0 : i32
    %c0_i32_0 = arith.constant 0 : i32
    %c0_i32_1 = arith.constant 0 : i32
    return %c0_i32, %c0_i32_0 : i32, i32
  }
  func.func @transform_3(%arg0: i32) -> (i32, i32) {
    %c0_i32 = arith.constant 0 : i32
    %c0_i32_0 = arith.constant 0 : i32
    %c0_i32_1 = arith.constant 0 : i32
    return %c0_i32, %c0_i32_0 : i32, i32
  }
  func.func @transform_4(%arg0: i32) -> (i32, i32) {
    %c0_i32 = arith.constant 0 : i32
    %c0_i32_0 = arith.constant 0 : i32
    %c0_i32_1 = arith.constant 0 : i32
    return %c0_i32, %c0_i32_0 : i32, i32
  }
  func.func @transform_5(%arg0: i32) -> (i32, i32) {
    %c0_i32 = arith.constant 0 : i32
    %c0_i32_0 = arith.constant 0 : i32
    %c0_i32_1 = arith.constant 0 : i32
    return %c0_i32, %c0_i32_0 : i32, i32
  }
  func.func @transform_6(%arg0: i32) -> (i32, i32) {
    %c0_i32 = arith.constant 0 : i32
    %c0_i32_0 = arith.constant 0 : i32
    %c0_i32_1 = arith.constant 0 : i32
    return %c0_i32, %c0_i32_0 : i32, i32
  }
}

</mosaic_0001>

<bundles_post_ra>
// kernel: tpu_custom_call.1
= control target key start
LH: loop header
LB: loop body
LE: loop exit
PB: predicated region body
PF: predicated region fallthrough
CT: control target
= control target key end

     0   :  { %vm41_vm0 = vcmask 64512   ;;  %v183_v3 = vlaneseq  ;;  %s1142_s28 = smov 32   ;;  %v1143_v21 = vmov 0.0   ;;  %vm1144_vm4 = vmmov 0   ;;  %s1145_s25 = smov 96   ;;  %s1416_s1 = inlined_call_operand.vmem [shape: f32[8,128], index: 1, kind: input, shape index: {}]   ;;  %s1417_s0 = inlined_call_operand.vmem [shape: f32[64,8], index: 0, kind: input, shape index: {}]   ;;  %s1418_s3 = inlined_call_operand.vmem [shape: f32[1,128], index: 3, kind: input, shape index: {}]   ;;  %s1419_s2 = inlined_call_operand.vmem [shape: f32[32,128], index: 2, kind: input, shape index: {}]   ;;  %s1420_s4 = inlined_call_operand.vmem [shape: f32[1,32], index: 4, kind: input, shape index: {}]   ;;  %s1421_s5 = inlined_call_operand.<no memory space> [shape: f32[1,1], index: 5, kind: input, shape index: {}]   ;;  %s1422_s6 = inlined_call_operand.vmem [shape: f32[8,1], index: 6, kind: output, shape index: {}]  }
   0x1   :  { %v33_v0 = vld [vmem:[%s1416_s1] sm:$0xff]  ;;  %v26_v2 = vld [vmem:[%s1417_s0 + $0x8] sm:$0xff]  ;;  %1027 = vmatprep.subr.mxu1 %v1143_v21  ;;  %v1214_v22 = vld [vmem:[%s1419_s2 + $0x18] sm:$0xff]  ;;  %1035 = vmatprep.mubr.msk.f32.mxu1 %vm1144_vm4, %v1143_v21  ;;  %vm217_vm5 = vcmask 261120   ;;  %v11_v9 = vstv %s1421_s5  ;;  %vm945_vm6 = vcmask 7168  }
   0x2   :  { %v25_v1 = vld [vmem:[%s1417_s0] sm:$0xff]  ;;  %1013 = vmatprep.subr.mxu0 %v33_v0  ;;  %v184_v4 = vand.u32 127, %v183_v3  ;;  %v1219_v23 = vld [vmem:[%s1419_s2 + $0x10] sm:$0xff]  ;;  %1028 = vmatpush3.msra.mxu1 %v1214_v22  ;;  %v1229_v24 = vld [vmem:[%s1419_s2 + $0x8] sm:$0xff]  ;;  %12 = vst [vmem:[#allocation3] sm:$0x1] %v11_v9 }
   0x3   :  { %1015 = vmatprep.mubr.msk.f32.mxu0 %vm41_vm0, %v25_v1  ;;  %1014 = vmatpush3.msra.mxu0 %v33_v0  ;;  %v1197_v6 = vld [vmem:[%s1418_s3] ss:$0 sm:$0xff]  ;;  %s1141_s3 = smov 64   ;;  %v27_v45 = vld [vmem:[%s1417_s0 + $0x10] sm:$0xff]  ;;  %v28_v46 = vld [vmem:[%s1417_s0 + $0x18] sm:$0xff] }
   0x4   :  { %1016 = vmatmul.mubr.msk.f32.vlgmr.msra.gmra.mxu0 %vm41_vm0, %v26_v2  ;;  %vm185_vm1 = vcmp.ge.s32.totalorder %v184_v4, 64  ;;  %vm186_vm2 = vcmp.lt.s32.totalorder %v184_v4, 96  ;;  %1049 = vmatprep.subr.mxu0 %v1143_v21  ;;  %v1238_v25 = vld [vmem:[%s1419_s2] sm:$0xff] }
   0x5   :  { %vm1200_vm3 = vmand %vm185_vm1, %vm186_vm2  ;;  %1029 = vmatprep.subr.mxu1 %v1143_v21  ;;  %1050 = vmatpush3.msra.mxu0 %v1214_v22  ;;  %v29_v4 = vld [vmem:[%s1417_s0 + $0x20] sm:$0xff] }
   0x6   :  { %1030 = vmatpush3.msra.mxu1 %v1219_v23  ;;  %1051 = vmatprep.subr.mxu0 %v1143_v21 }
   0x7   :  { %1031 = vmatprep.subr.mxu1 %v1143_v21  ;;  %1052 = vmatpush3.msra.mxu0 %v1219_v23 }
   0x8   :  { %1032 = vmatpush3.msra.mxu1 %v1229_v24  ;;  %1053 = vmatprep.subr.mxu0 %v1143_v21 }
   0x9   :  { %1033 = vmatprep.subr.mxu1 %v1143_v21  ;;  %1054 = vmatpush3.msra.mxu0 %v1229_v24 }
   0xa   :  { %1034 = vmatpush3.msra.mxu1 %v1238_v25  ;;  %1055 = vmatprep.subr.mxu0 %v1143_v21 }
   0xb   :  { %1038 = vmatprep.subr.mxu1 %v1143_v21  ;;  %1056 = vmatpush3.msra.mxu0 %v1238_v25 }
   0xc   :  { %1071 = vmatprep.subr.mxu0 %v1143_v21  ;;  %1018 = vmatprep.mubr.msk.f32.mxu0 %vm41_vm0, %v27_v45 }
   0xd   :  { %1019 = vmatmul.mubr.msk.f32.gmra.mxu0 %vm41_vm0, %v28_v46 }
   0xe   :  { %1021 = vmatprep.mubr.msk.f32.mxu0 %vm41_vm0, %v29_v4 }
  0xc4   :  { %v1192_v5 = vpop.f32.mrf.mxu0 }
  0xc5   :  { %v138_v30 = vadd.f32 %v1192_v5, %v1197_v6  ;;  %v30_v5 = vld [vmem:[%s1417_s0 + $0x28] sm:$0xff] }
  0xc6   :  { %v132_v7 = vpop.f32.mrf.mxu0  ;;  %1022 = vmatmul.mubr.msk.f32.gmra.mxu0 %vm41_vm0, %v30_v5 }
  0xc7   :  { %v133_v8 = vadd.f32 %v1197_v6, %v132_v7  ;;  %v31_v7 = vld [vmem:[%s1417_s0 + $0x30] sm:$0xff] }
  0xc8   :  { %1024 = vmatprep.mubr.msk.f32.mxu0 %vm41_vm0, %v31_v7 }
  0xc9   :  { %v189_v10 = vmul.f32 0.5, %v133_v8 }
  0xcb   :  { %v190_v11 = vsel %vm1200_vm3, %v133_v8, %v189_v10  ;;  %v32_v8 = vld [vmem:[%s1417_s0 + $0x38] sm:$0xff] }
  0xcc   :  { %1109 = vtanh.f32 %v190_v11  ;;  %1025 = vmatmul.mubr.msk.f32.gmra.mxu0 %vm41_vm0, %v32_v8 }
  0xcd   :  { %v1020_v51 = vpop.f32.mrf.mxu0  ;;  %1057 = vmatprep.mubr.msk.f32.mxu0 %vm1144_vm4, %v1143_v21 }
  0xcf   :  { %v142_v52 = vpop.f32.mrf.mxu0 }
  0xd0   :  { %v143_v53 = vadd.f32 %v1197_v6, %v142_v52 }
  0xd9   :  { %v1110_v12 = vpop.eup %1109 }
  0xda   :  { %v192_v13 = vmul.f32 0.5, %v1110_v12 }
  0xdc   :  { %v193_v14 = vadd.f32 0.5, %v192_v13 }
  0xde   :  { %v194_v15 = vsel %vm1200_vm3, %v1110_v12, %v193_v14 }
  0xdf   :  { %197 = vrot.lane.b32.xlu0 %v194_v15, %s1141_s3  ;;  %v195_v18 = vmul.f32 0.0, %v194_v15 }
 0x151   :  { %v198_v16 = vpop.permute.xlu0 %197 }
 0x152   :  { %v200_v17 = vmul.f32 %v198_v16, %v194_v15 }
 0x154   :  { %202 = vrot.lane.b32.xlu0 %v200_v17, %s1142_s28 }
 0x186   :  { %v1330_v14 = vpop.f32.mrf.mxu0 }
 0x1c6   :  { %v203_v19 = vpop.permute.xlu0 %202 }
 0x1c7   :  { %v205_v20 = vadd.f32 %v203_v19, %v195_v18  ;;  %v148_v18 = vadd.f32 %v1020_v51, %v1197_v6 }
 0x1c9   :  { %1111 = vtanh.f32 %v205_v20 }
 0x1d6   :  { %v1112_v26 = vpop.eup %1111 }
 0x1d7   :  { %208 = vrot.lane.b32.xlu1 %v1112_v26, %s1141_s3 }
 0x249   :  { %v209_v27 = vpop.permute.xlu1 %208 }
 0x24a   :  { %v211_v28 = vmul.f32 %v209_v27, %v194_v15  ;;  %v152_v15 = vpop.f32.mrf.mxu0 }
 0x24c   :  { %215 = vrot.lane.b32.xlu1 %v211_v28, %s1142_s28  ;;  %v1332_v16 = vpop.f32.mrf.mxu0 }
 0x24e   :  { %v1334_v17 = vpop.f32.mrf.mxu0 }
 0x2be   :  { %v216_v29 = vpop.permute.xlu1 %215 }
 0x2bf   :  { %1036 = vmatmul.mubr.msk.f32.vlgmr.msra.gmra.mxu1 %vm217_vm5, %v216_v29 }
 0x2c0   :  { %1039 = vmatpush3.msra.mxu1 %v1214_v22  ;;  %1046 = vmatprep.mubr.msk.f32.mxu1 %vm1144_vm4, %v1143_v21 }
 0x2c1   :  { %1040 = vmatprep.subr.mxu1 %v1143_v21 }
 0x2c2   :  { %1041 = vmatpush3.msra.mxu1 %v1219_v23 }
 0x2c3   :  { %1042 = vmatprep.subr.mxu1 %v1143_v21 }
 0x2c4   :  { %1043 = vmatpush3.msra.mxu1 %v1229_v24 }
 0x2c5   :  { %1044 = vmatprep.subr.mxu1 %v1143_v21 }
 0x2c6   :  { %1045 = vmatpush3.msra.mxu1 %v1238_v25 }
 0x2c7   :  { %1060 = vmatprep.subr.mxu1 %v1143_v21 }
 0x37f   :  { %v286_v31 = vpop.f32.mrf.mxu1 }
 0x380   :  { %v290_v32 = vadd.f32 %v286_v31, %v138_v30 }
 0x381   :  { %v1037_v33 = vpop.f32.mrf.mxu1 }
 0x382   :  { %v291_v34 = vmul.f32 0.5, %v290_v32 }
 0x384   :  { %v292_v35 = vsel %vm1200_vm3, %v290_v32, %v291_v34 }
 0x385   :  { %1113 = vtanh.f32 %v292_v35 }
 0x392   :  { %v1114_v36 = vpop.eup %1113 }
 0x393   :  { %v294_v37 = vmul.f32 0.5, %v1114_v36 }
 0x395   :  { %v295_v38 = vadd.f32 0.5, %v294_v37 }
 0x397   :  { %v296_v39 = vsel %vm1200_vm3, %v1114_v36, %v295_v38 }
 0x398   :  { %299 = vrot.lane.b32.xlu0 %v296_v39, %s1141_s3  ;;  %v297_v42 = vmul.f32 %v296_v39, %v205_v20 }
 0x40a   :  { %v300_v40 = vpop.permute.xlu0 %299 }
 0x40b   :  { %v302_v41 = vmul.f32 %v300_v40, %v296_v39 }
 0x40d   :  { %304 = vrot.lane.b32.xlu1 %v302_v41, %s1142_s28 }
 0x47f   :  { %v305_v43 = vpop.permute.xlu1 %304 }
 0x480   :  { %v307_v44 = vadd.f32 %v305_v43, %v297_v42  ;;  %v153_v42 = vadd.f32 %v1197_v6, %v152_v15 }
 0x482   :  { %1115 = vtanh.f32 %v307_v44 }
 0x48f   :  { %v1116_v47 = vpop.eup %1115 }
 0x490   :  { %310 = vrot.lane.b32.xlu0 %v1116_v47, %s1141_s3 }
 0x502   :  { %v311_v48 = vpop.permute.xlu0 %310 }
 0x503   :  { %v313_v49 = vmul.f32 %v311_v48, %v296_v39 }
 0x505   :  { %317 = vrot.lane.b32.xlu1 %v313_v49, %s1142_s28 }
 0x577   :  { %v318_v50 = vpop.permute.xlu1 %317 }
 0x578   :  { %1047 = vmatmul.mubr.msk.f32.vlgmr.msra.gmra.mxu1 %vm217_vm5, %v318_v50 }
 0x579   :  { %1061 = vmatpush3.msra.mxu1 %v1214_v22  ;;  %1068 = vmatprep.mubr.msk.f32.mxu1 %vm1144_vm4, %v1143_v21 }
 0x57a   :  { %1062 = vmatprep.subr.mxu1 %v1143_v21 }
 0x57b   :  { %1063 = vmatpush3.msra.mxu1 %v1219_v23 }
 0x57c   :  { %1064 = vmatprep.subr.mxu1 %v1143_v21 }
 0x57d   :  { %1065 = vmatpush3.msra.mxu1 %v1229_v24 }
 0x57e   :  { %1066 = vmatprep.subr.mxu1 %v1143_v21 }
 0x57f   :  { %1067 = vmatpush3.msra.mxu1 %v1238_v25 }
 0x580   :  { %1082 = vmatprep.subr.mxu1 %v1143_v21 }
 0x638   :  { %v387_v54 = vpop.f32.mrf.mxu1 }
 0x639   :  { %v391_v55 = vadd.f32 %v387_v54, %v143_v53 }
 0x63a   :  { %v1048_v56 = vpop.f32.mrf.mxu1 }
 0x63b   :  { %v392_v57 = vmul.f32 0.5, %v391_v55 }
 0x63d   :  { %v393_v58 = vsel %vm1200_vm3, %v391_v55, %v392_v57 }
 0x63e   :  { %1117 = vtanh.f32 %v393_v58 }
 0x64b   :  { %v1118_v59 = vpop.eup %1117 }
 0x64c   :  { %v395_v60 = vmul.f32 0.5, %v1118_v59 }
 0x64e   :  { %v396_v61 = vadd.f32 0.5, %v395_v60 }
 0x650   :  { %v397_v62 = vsel %vm1200_vm3, %v1118_v59, %v396_v61  ;;  %v158_v61 = vadd.f32 %v1330_v14, %v1197_v6 }
 0x651   :  { %400 = vrot.lane.b32.xlu0 %v397_v62, %s1141_s3  ;;  %v398_v1 = vmul.f32 %v397_v62, %v307_v44 }
 0x6c3   :  { %v401_v63 = vpop.permute.xlu0 %400 }
 0x6c4   :  { %v403_v0 = vmul.f32 %v401_v63, %v397_v62 }
 0x6c6   :  { %405 = vrot.lane.b32.xlu1 %v403_v0, %s1142_s28 }
 0x738   :  { %v406_v2 = vpop.permute.xlu1 %405 }
 0x739   :  { %v408_v3 = vadd.f32 %v406_v2, %v398_v1 }
 0x73b   :  { %1119 = vtanh.f32 %v408_v3 }
 0x748   :  { %v1120_v10 = vpop.eup %1119 }
 0x749   :  { %411 = vrot.lane.b32.xlu0 %v1120_v10, %s1141_s3 }
 0x7bb   :  { %v412_v11 = vpop.permute.xlu0 %411 }
 0x7bc   :  { %v414_v12 = vmul.f32 %v412_v11, %v397_v62 }
 0x7be   :  { %418 = vrot.lane.b32.xlu1 %v414_v12, %s1142_s28 }
 0x830   :  { %v419_v13 = vpop.permute.xlu1 %418 }
 0x831   :  { %1058 = vmatmul.mubr.msk.f32.vlgmr.msra.gmra.mxu0 %vm217_vm5, %v419_v13  ;;  %v163_v13 = vadd.f32 %v1197_v6, %v1334_v17 }
 0x832   :  { %1072 = vmatpush3.msra.mxu0 %v1214_v22  ;;  %1079 = vmatprep.mubr.msk.f32.mxu0 %vm1144_vm4, %v1143_v21 }
 0x833   :  { %1073 = vmatprep.subr.mxu0 %v1143_v21 }
 0x834   :  { %1074 = vmatpush3.msra.mxu0 %v1219_v23 }
 0x835   :  { %1075 = vmatprep.subr.mxu0 %v1143_v21 }
 0x836   :  { %1076 = vmatpush3.msra.mxu0 %v1229_v24 }
 0x837   :  { %1077 = vmatprep.subr.mxu0 %v1143_v21 }
 0x838   :  { %1078 = vmatpush3.msra.mxu0 %v1238_v25 }
 0x839   :  { %1093 = vmatprep.subr.mxu0 %v1143_v21 }
 0x8f1   :  { %v488_v19 = vpop.f32.mrf.mxu0 }
 0x8f2   :  { %v492_v20 = vadd.f32 %v488_v19, %v148_v18 }
 0x8f3   :  { %v1059_v26 = vpop.f32.mrf.mxu0 }
 0x8f4   :  { %v493_v27 = vmul.f32 0.5, %v492_v20 }
 0x8f6   :  { %v494_v28 = vsel %vm1200_vm3, %v492_v20, %v493_v27 }
 0x8f7   :  { %1121 = vtanh.f32 %v494_v28 }
 0x904   :  { %v1122_v29 = vpop.eup %1121 }
 0x905   :  { %v496_v30 = vmul.f32 0.5, %v1122_v29 }
 0x907   :  { %v497_v31 = vadd.f32 0.5, %v496_v30 }
 0x909   :  { %v498_v32 = vsel %vm1200_vm3, %v1122_v29, %v497_v31 }
 0x90a   :  { %501 = vrot.lane.b32.xlu0 %v498_v32, %s1141_s3  ;;  %v499_v35 = vmul.f32 %v498_v32, %v408_v3 }
 0x97c   :  { %v502_v33 = vpop.permute.xlu0 %501 }
 0x97d   :  { %v504_v34 = vmul.f32 %v502_v33, %v498_v32 }
 0x97f   :  { %506 = vrot.lane.b32.xlu1 %v504_v34, %s1142_s28 }
 0x9f1   :  { %v507_v36 = vpop.permute.xlu1 %506 }
 0x9f2   :  { %v509_v37 = vadd.f32 %v507_v36, %v499_v35 }
 0x9f4   :  { %1123 = vtanh.f32 %v509_v37 }
 0xa01   :  { %v1124_v38 = vpop.eup %1123 }
 0xa02   :  { %512 = vrot.lane.b32.xlu0 %v1124_v38, %s1141_s3  ;;  %v168_v38 = vadd.f32 %v1332_v16, %v1197_v6  ;;  %v967_v6 = vld [vmem:[%s1420_s4] ss:$0 sm:$0xff] }
 0xa74   :  { %v513_v39 = vpop.permute.xlu0 %512 }
 0xa75   :  { %v515_v40 = vmul.f32 %v513_v39, %v498_v32 }
 0xa77   :  { %519 = vrot.lane.b32.xlu1 %v515_v40, %s1142_s28 }
 0xae9   :  { %v520_v41 = vpop.permute.xlu1 %519 }
 0xaea   :  { %1069 = vmatmul.mubr.msk.f32.vlgmr.msra.gmra.mxu1 %vm217_vm5, %v520_v41 }
 0xaeb   :  { %1083 = vmatpush3.msra.mxu1 %v1214_v22  ;;  %1090 = vmatprep.mubr.msk.f32.mxu1 %vm1144_vm4, %v1143_v21 }
 0xaec   :  { %1084 = vmatprep.subr.mxu1 %v1143_v21 }
 0xaed   :  { %1085 = vmatpush3.msra.mxu1 %v1219_v23 }
 0xaee   :  { %1086 = vmatprep.subr.mxu1 %v1143_v21 }
 0xaef   :  { %1087 = vmatpush3.msra.mxu1 %v1229_v24 }
 0xaf0   :  { %1088 = vmatprep.subr.mxu1 %v1143_v21 }
 0xaf1   :  { %1089 = vmatpush3.msra.mxu1 %v1238_v25 }
 0xbaa   :  { %v589_v43 = vpop.f32.mrf.mxu1 }
 0xbab   :  { %v593_v44 = vadd.f32 %v589_v43, %v153_v42 }
 0xbac   :  { %v1070_v45 = vpop.f32.mrf.mxu1 }
 0xbad   :  { %v594_v46 = vmul.f32 0.5, %v593_v44 }
 0xbaf   :  { %v595_v47 = vsel %vm1200_vm3, %v593_v44, %v594_v46 }
 0xbb0   :  { %1125 = vtanh.f32 %v595_v47 }
 0xbbd   :  { %v1126_v48 = vpop.eup %1125 }
 0xbbe   :  { %v597_v49 = vmul.f32 0.5, %v1126_v48 }
 0xbc0   :  { %v598_v50 = vadd.f32 0.5, %v597_v49 }
 0xbc2   :  { %v599_v51 = vsel %vm1200_vm3, %v1126_v48, %v598_v50 }
 0xbc3   :  { %602 = vrot.lane.b32.xlu0 %v599_v51, %s1141_s3  ;;  %v600_v54 = vmul.f32 %v599_v51, %v509_v37 }
 0xc35   :  { %v603_v52 = vpop.permute.xlu0 %602 }
 0xc36   :  { %v605_v53 = vmul.f32 %v603_v52, %v599_v51 }
 0xc38   :  { %607 = vrot.lane.b32.xlu1 %v605_v53, %s1142_s28 }
 0xcaa   :  { %v608_v55 = vpop.permute.xlu1 %607 }
 0xcab   :  { %v610_v56 = vadd.f32 %v608_v55, %v600_v54 }
 0xcad   :  { %1127 = vtanh.f32 %v610_v56 }
 0xcba   :  { %v1128_v57 = vpop.eup %1127 }
 0xcbb   :  { %613 = vrot.lane.b32.xlu0 %v1128_v57, %s1141_s3 }
 0xd2d   :  { %v614_v58 = vpop.permute.xlu0 %613 }
 0xd2e   :  { %v616_v59 = vmul.f32 %v614_v58, %v599_v51 }
 0xd30   :  { %620 = vrot.lane.b32.xlu1 %v616_v59, %s1142_s28  ;;  %v968_v59 = vld [vmem:[#allocation3] ss:$0 sm:$0xff] }
 0xda2   :  { %v621_v60 = vpop.permute.xlu1 %620 }
 0xda3   :  { %1080 = vmatmul.mubr.msk.f32.vlgmr.msra.gmra.mxu0 %vm217_vm5, %v621_v60 }
 0xda4   :  { %1094 = vmatpush3.msra.mxu0 %v1214_v22  ;;  %1101 = vmatprep.mubr.msk.f32.mxu0 %vm1144_vm4, %v1143_v21 }
 0xda5   :  { %1095 = vmatprep.subr.mxu0 %v1143_v21 }
 0xda6   :  { %1096 = vmatpush3.msra.mxu0 %v1219_v23 }
 0xda7   :  { %1097 = vmatprep.subr.mxu0 %v1143_v21 }
 0xda8   :  { %1098 = vmatpush3.msra.mxu0 %v1229_v24 }
 0xda9   :  { %1099 = vmatprep.subr.mxu0 %v1143_v21 }
 0xdaa   :  { %1100 = vmatpush3.msra.mxu0 %v1238_v25 }
 0xe63   :  { %v690_v62 = vpop.f32.mrf.mxu0 }
 0xe64   :  { %v694_v22 = vadd.f32 %v690_v62, %v158_v61 }
 0xe65   :  { %v1081_v63 = vpop.f32.mrf.mxu0 }
 0xe66   :  { %v695_v0 = vmul.f32 0.5, %v694_v22 }
 0xe68   :  { %v696_v1 = vsel %vm1200_vm3, %v694_v22, %v695_v0 }
 0xe69   :  { %1129 = vtanh.f32 %v696_v1 }
 0xe76   :  { %v1130_v23 = vpop.eup %1129 }
 0xe77   :  { %v698_v2 = vmul.f32 0.5, %v1130_v23 }
 0xe79   :  { %v699_v3 = vadd.f32 0.5, %v698_v2 }
 0xe7b   :  { %v700_v24 = vsel %vm1200_vm3, %v1130_v23, %v699_v3 }
 0xe7c   :  { %703 = vrot.lane.b32.xlu0 %v700_v24, %s1141_s3  ;;  %v701_v4 = vmul.f32 %v700_v24, %v610_v56 }
 0xeee   :  { %v704_v21 = vpop.permute.xlu0 %703 }
 0xeef   :  { %v706_v25 = vmul.f32 %v704_v21, %v700_v24 }
 0xef1   :  { %708 = vrot.lane.b32.xlu1 %v706_v25, %s1142_s28 }
 0xf63   :  { %v709_v5 = vpop.permute.xlu1 %708 }
 0xf64   :  { %v711_v7 = vadd.f32 %v709_v5, %v701_v4 }
 0xf66   :  { %1131 = vtanh.f32 %v711_v7 }
 0xf73   :  { %v1132_v8 = vpop.eup %1131 }
 0xf74   :  { %714 = vrot.lane.b32.xlu0 %v1132_v8, %s1141_s3 }
 0xfe6   :  { %v715_v10 = vpop.permute.xlu0 %714 }
 0xfe7   :  { %v717_v11 = vmul.f32 %v715_v10, %v700_v24 }
 0xfe9   :  { %721 = vrot.lane.b32.xlu1 %v717_v11, %s1142_s28 }
0x105b   :  { %v722_v12 = vpop.permute.xlu1 %721 }
0x105c   :  { %1091 = vmatmul.mubr.msk.f32.vlgmr.msra.gmra.mxu1 %vm217_vm5, %v722_v12 }
0x111c   :  { %v791_v14 = vpop.f32.mrf.mxu1 }
0x111d   :  { %v795_v15 = vadd.f32 %v791_v14, %v163_v13 }
0x111e   :  { %v1092_v18 = vpop.f32.mrf.mxu1 }
0x111f   :  { %v796_v19 = vmul.f32 0.5, %v795_v15 }
0x1121   :  { %v797_v20 = vsel %vm1200_vm3, %v795_v15, %v796_v19 }
0x1122   :  { %1133 = vtanh.f32 %v797_v20 }
0x112f   :  { %v1134_v26 = vpop.eup %1133 }
0x1130   :  { %v799_v27 = vmul.f32 0.5, %v1134_v26 }
0x1132   :  { %v800_v28 = vadd.f32 0.5, %v799_v27 }
0x1134   :  { %v801_v29 = vsel %vm1200_vm3, %v1134_v26, %v800_v28 }
0x1135   :  { %804 = vrot.lane.b32.xlu0 %v801_v29, %s1141_s3  ;;  %v802_v17 = vmul.f32 %v801_v29, %v711_v7 }
0x11a7   :  { %v805_v30 = vpop.permute.xlu0 %804 }
0x11a8   :  { %v807_v31 = vmul.f32 %v805_v30, %v801_v29 }
0x11aa   :  { %809 = vrot.lane.b32.xlu1 %v807_v31, %s1142_s28 }
0x121c   :  { %v810_v32 = vpop.permute.xlu1 %809 }
0x121d   :  { %v812_v33 = vadd.f32 %v810_v32, %v802_v17 }
0x121f   :  { %1135 = vtanh.f32 %v812_v33 }
0x122c   :  { %v1136_v34 = vpop.eup %1135 }
0x122d   :  { %815 = vrot.lane.b32.xlu0 %v1136_v34, %s1141_s3 }
0x129f   :  { %v816_v35 = vpop.permute.xlu0 %815 }
0x12a0   :  { %v818_v36 = vmul.f32 %v816_v35, %v801_v29 }
0x12a2   :  { %822 = vrot.lane.b32.xlu1 %v818_v36, %s1142_s28 }
0x1314   :  { %v823_v37 = vpop.permute.xlu1 %822 }
0x1315   :  { %1102 = vmatmul.mubr.msk.f32.vlgmr.msra.gmra.mxu0 %vm217_vm5, %v823_v37 }
0x13d5   :  { %v892_v39 = vpop.f32.mrf.mxu0 }
0x13d6   :  { %v896_v40 = vadd.f32 %v892_v39, %v168_v38 }
0x13d7   :  { %v1103_v41 = vpop.f32.mrf.mxu0 }
0x13d8   :  { %v897_v42 = vmul.f32 0.5, %v896_v40 }
0x13da   :  { %v898_v43 = vsel %vm1200_vm3, %v896_v40, %v897_v42 }
0x13db   :  { %1137 = vtanh.f32 %v898_v43 }
0x13e8   :  { %v1138_v44 = vpop.eup %1137 }
0x13e9   :  { %v900_v45 = vmul.f32 0.5, %v1138_v44 }
0x13eb   :  { %v901_v46 = vadd.f32 0.5, %v900_v45 }
0x13ed   :  { %v902_v47 = vsel %vm1200_vm3, %v1138_v44, %v901_v46 }
0x13ee   :  { %905 = vrot.lane.b32.xlu0 %v902_v47, %s1141_s3  ;;  %v903_v16 = vmul.f32 %v902_v47, %v812_v33 }
0x1460   :  { %v906_v48 = vpop.permute.xlu0 %905 }
0x1461   :  { %v908_v49 = vmul.f32 %v906_v48, %v902_v47 }
0x1463   :  { %910 = vrot.lane.b32.xlu1 %v908_v49, %s1142_s28 }
0x1467   :  { %926 = vrot.lane.b32.xlu1 %v967_v6, %s1145_s25 }
0x14d5   :  { %v911_v50 = vpop.permute.xlu1 %910 }
0x14d6   :  { %v913_v51 = vadd.f32 %v911_v50, %v903_v16 }
0x14d8   :  { %1139 = vtanh.f32 %v913_v51 }
0x14d9   :  { %v927_v54 = vpop.permute.xlu1 %926 }
0x14e5   :  { %v1140_v52 = vpop.eup %1139 }
0x14e6   :  { %916 = vrot.lane.b32.xlu0 %v1140_v52, %s1141_s3 }
0x1558   :  { %v917_v53 = vpop.permute.xlu0 %916 }
0x1559   :  { %v919_v55 = vmul.f32 %v917_v53, %v902_v47 }
0x155b   :  { %v929_v56 = vmul.f32 %v927_v54, %v919_v55 }
0x155d   :  { %931 = vrot.lane.b32.xlu0 %v929_v56, %s1142_s28 }
0x15cf   :  { %v932_v57 = vpop.permute.xlu0 %931 }
0x15d0   :  { %v934_v58 = vsel %vm217_vm5, %v932_v57, 0.0 }
0x15d1   :  { %935 = vadd.xlane.f32.xlu1 %v934_v58 }
0x165a   :  { %v936_v60 = vpop.xlane.xlu1 %935 }
0x165b   :  { %v944_v61 = vadd.f32 %v968_v59, %v936_v60 }
0x165d   :  { %946 = vst.msk [vmem:[%s1422_s6] sm:$0xff] %vm945_vm6, %v944_v61 }

</bundles_post_ra>
